<compile_context>
chip_gen: v6e
topology: v6e:2x2x1
jax: 0.10.0
libtpu: 0.0.40
codegen_flags: <defaults>
</compile_context>

<pallas_src>
import functools

import jax
import jax.numpy as jnp
from jax.experimental import pallas as pl
from jax.experimental.pallas import tpu as pltpu


def _focal_loss_kernel(x_ref, y_ref, alpha_ref, loss_ref, cnt_ref, *,
                       gamma, ignore_index, hw):
    i = pl.program_id(1)              # pixel-tile index (reduction / 'arbitrary' axis)

    @pl.when(i == 0)
    def _init():
        loss_ref[...] = jnp.zeros_like(loss_ref)
        cnt_ref[...] = jnp.zeros_like(cnt_ref)

    x = x_ref[0].astype(jnp.float32)             # (C, TN) logits, classes on sublanes
    y = y_ref[0]                                 # (1, TN) int32 labels
    alpha = alpha_ref[...].astype(jnp.float32)   # (C, 1) per-class weights

    C, TN = x.shape

    # In-kernel mask for the ragged tail of the last lane tile (no host padding).
    lane = jax.lax.broadcasted_iota(jnp.int32, (1, TN), 1)
    in_bounds = (i * TN + lane) < hw                             # (1, TN)
    y = jnp.where(in_bounds, y, ignore_index)
    valid = y != ignore_index                                    # (1, TN)
    # Zero stale out-of-bounds logits so they cannot inject NaN/Inf.
    x = jnp.where(in_bounds, x, 0.0)

    # log-softmax over the class (sublane) axis.
    m = jnp.max(x, axis=0, keepdims=True)                        # (1, TN)
    z = x - m
    lse = jnp.log(jnp.sum(jnp.exp(z), axis=0, keepdims=True))    # (1, TN)
    log_p = z - lse                                              # (C, TN)

    # One-hot gather of log_p[y] and alpha[y] along the class axis.
    # NOTE: out-of-range labels (not ignore_index) contribute 0 loss but are
    # still counted in the denominator (PyTorch would raise on such input).
    cls = jax.lax.broadcasted_iota(jnp.int32, (C, TN), 0)
    onehot = cls == y                                            # (C, TN)
    log_pt = jnp.sum(jnp.where(onehot, log_p, 0.0), axis=0, keepdims=True)  # (1, TN)
    w = jnp.sum(jnp.where(onehot, alpha, 0.0), axis=0, keepdims=True)       # (1, TN)

    ce = -w * log_pt                     # alpha-weighted NLL (reduction='none')
    pt = jnp.exp(log_pt)
    omp = jnp.maximum(1.0 - pt, 0.0)

    # Focal term, specialized at trace time (gamma=2 -> one VPU multiply).
    g = float(gamma)
    if g == 0.0:
        focal = jnp.ones_like(omp)
    elif g.is_integer() and 0 < g <= 8:
        focal = omp
        for _ in range(int(g) - 1):
            focal = focal * omp
    else:
        focal = jnp.power(omp, g)

    loss = jnp.where(valid, focal * ce, 0.0)                     # (1, TN)

    # Deferred reduction: plain VPU adds into lane-wide per-batch accumulators
    # that stay resident in VMEM across the whole reduction axis.
    loss_ref[...] += loss.reshape(loss_ref.shape)
    cnt_ref[...] += valid.astype(jnp.float32).reshape(cnt_ref.shape)


def _pick_tile_hw(hw, c, itemsize, target_block_bytes=1 << 20):
    """Lane-tile width so one (C, tile) logits block is ~1 MiB (fits every gen,
    including v7x's 32 MiB scoped VMEM with double buffering + temporaries)."""
    t = max(128, ((target_block_bytes // (c * itemsize)) // 128) * 128)
    t = min(t, 1 << 16)
    # Full extent is always a legal block shape, and avoids any tail masking work.
    return hw if hw <= t else t


def focal_loss(x, y, alpha=None, gamma=2.0, ignore_index=-100, reduction="mean"):
    """Pallas FocalLoss forward.

    x: (B, C) or (B, C, d1, ..., dK) raw logits; y: (B,) or (B, d1, ..., dK) labels.
    """
    if reduction not in ("mean", "sum", "none"):
        raise ValueError('Reduction must be one of: "mean", "sum", "none".')
    if reduction == "none":
        # TODO(synk): PyTorch's 'none' reduction returns only the *valid* (non-ignored)
        # elements, which is a data-dependent shape; only 'mean'/'sum' are kernelized.
        raise NotImplementedError("reduction='none' not implemented in the Pallas kernel")

    C = x.shape[1]
    if x.ndim > 2:
        # (B, C, d1..dK) -> (B, C, HW): free reshape, no transpose / extra HBM pass.
        B = x.shape[0]
        hw = 1
        for d in x.shape[2:]:
            hw *= d
        x3 = x.reshape(B, C, hw)
        y3 = y.reshape(B, 1, hw).astype(jnp.int32)
    else:
        # (B, C) classification: put the samples on the lane axis (one small transpose).
        B = 1
        hw = x.shape[0]
        x3 = jnp.transpose(x, (1, 0)).reshape(1, C, hw)
        y3 = y.reshape(1, 1, hw).astype(jnp.int32)

    if alpha is None:
        alpha_arr = jnp.ones((C, 1), jnp.float32)
    else:
        alpha_arr = jnp.asarray(alpha, jnp.float32).reshape(C, 1)

    tile_hw = _pick_tile_hw(hw, C, x.dtype.itemsize)
    n_tiles = pl.cdiv(hw, tile_hw)

    kernel = functools.partial(
        _focal_loss_kernel, gamma=float(gamma), ignore_index=int(ignore_index), hw=hw
    )

    n_elems = B * hw
    cost = pl.CostEstimate(
        flops=8 * n_elems * C,
        transcendentals=n_elems * (C + 2),
        bytes_accessed=x3.size * x3.dtype.itemsize + y3.size * 4 + 2 * B * tile_hw * 4,
    )

    loss_part, cnt_part = pl.pallas_call(
        kernel,
        out_shape=(
            jax.ShapeDtypeStruct((B, 1, tile_hw), jnp.float32),
            jax.ShapeDtypeStruct((B, 1, tile_hw), jnp.float32),
        ),
        grid_spec=pltpu.PrefetchScalarGridSpec(
            num_scalar_prefetch=0,
            grid=(B, n_tiles),
            in_specs=[
                pl.BlockSpec((1, C, tile_hw), lambda b, i: (b, 0, i)),   # logits
                pl.BlockSpec((1, 1, tile_hw), lambda b, i: (b, 0, i)),   # labels
                pl.BlockSpec((C, 1), lambda b, i: (0, 0)),               # alpha (resident)
            ],
            out_specs=(
                pl.BlockSpec((1, 1, tile_hw), lambda b, i: (b, 0, 0)),   # per-b loss partials
                pl.BlockSpec((1, 1, tile_hw), lambda b, i: (b, 0, 0)),   # per-b valid counts
            ),
        ),
        compiler_params=pltpu.CompilerParams(
            dimension_semantics=("parallel", "arbitrary"),
            vmem_limit_bytes=32 * 1024 * 1024,
        ),
        cost_estimate=cost,
    )(x3, y3, alpha_arr)

    total = jnp.sum(loss_part)
    cnt = jnp.sum(cnt_part)
    if reduction == "sum":
        return total
    # 'mean': if every label is ignore_index, PyTorch returns 0.0.
    return jnp.where(cnt > 0, total / jnp.maximum(cnt, 1.0), jnp.float32(0.0))


def focal_loss_ref(x, y, alpha=None, gamma=2.0, ignore_index=-100, reduction="mean"):
    """Pure-JAX reference mirroring the PyTorch forward."""
    C = x.shape[1]
    if x.ndim > 2:
        perm = (0,) + tuple(range(2, x.ndim)) + (1,)
        x2 = jnp.transpose(x, perm).reshape(-1, C)
        y2 = y.reshape(-1)
    else:
        x2, y2 = x, y
    mask = y2 != ignore_index
    y_safe = jnp.clip(y2, 0, C - 1)
    log_p = jax.nn.log_softmax(x2.astype(jnp.float32), axis=-1)
    log_pt = jnp.take_along_axis(log_p, y_safe[:, None], axis=-1)[:, 0]
    w = (jnp.ones((C,), jnp.float32) if alpha is None
         else jnp.asarray(alpha, jnp.float32))[y_safe]
    ce = -w * log_pt
    pt = jnp.exp(log_pt)
    loss = ((1.0 - pt) ** gamma) * ce
    loss = jnp.where(mask, loss, 0.0)
    cnt = jnp.sum(mask)
    total = jnp.sum(loss)
    if reduction == "sum":
        return total
    return jnp.where(cnt > 0, total / jnp.maximum(cnt, 1), jnp.float32(0.0))


if __name__ == "__main__":
    gamma = 2.0
    ignore_index = -100

    key = jax.random.PRNGKey(0)
    kx, ky, km, kx2, ky2 = jax.random.split(key, 5)

    # --- Segmentation-style NCHW case -------------------------------------
    B, C, H, W = 2, 4, 16, 16
    x = jax.random.normal(kx, (B, C, H, W), dtype=jnp.float32)      # NCHW logits
    y = jax.random.randint(ky, (B, H, W), 0, C, dtype=jnp.int32)    # class labels
    ignore_mask = jax.random.uniform(km, (B, H, W)) < 0.1
    y = jnp.where(ignore_mask, jnp.int32(ignore_index), y)
    alpha = 0.5 + 0.1 * jnp.arange(C, dtype=jnp.float32)

    out = focal_loss(x, y, alpha, gamma=gamma, ignore_index=ignore_index, reduction="mean")
    out = jax.block_until_ready(out)
    ref = focal_loss_ref(x, y, alpha, gamma=gamma, ignore_index=ignore_index)
    assert jnp.allclose(out, ref, rtol=1e-5, atol=1e-6), (out, ref)

    # --- Plain (B, C) classification case ----------------------------------
    Bc = 16
    xc = jax.random.normal(kx2, (Bc, C), dtype=jnp.float32)
    yc = jax.random.randint(ky2, (Bc,), 0, C, dtype=jnp.int32)
    out2 = focal_loss(xc, yc, alpha, gamma=gamma, ignore_index=ignore_index, reduction="sum")
    out2 = jax.block_until_ready(out2)
    ref2 = focal_loss_ref(xc, yc, alpha, gamma=gamma, ignore_index=ignore_index, reduction="sum")
    assert jnp.allclose(out2, ref2, rtol=1e-5, atol=1e-6), (out2, ref2)

    print("KERNEL_OK")
</pallas_src>

<mosaic_0001>
module attributes {stable_mosaic.version = 11 : i64} {
  func.func @_focal_loss_kernel(%arg0: i32, %arg1: i32, %arg2: memref<1x4x256xf32, #tpu.memory_space<vmem>>, %arg3: memref<1x1x256xi32, #tpu.memory_space<vmem>>, %arg4: memref<4x1xf32, #tpu.memory_space<vmem>>, %arg5: memref<1x1x256xf32, #tpu.memory_space<vmem>>, %arg6: memref<1x1x256xf32, #tpu.memory_space<vmem>>) attributes {dimension_semantics = [#tpu.dimension_semantics<parallel>, #tpu.dimension_semantics<arbitrary>], iteration_bounds = array<i64: 2, 1>, scalar_prefetch = 0 : i64, scratch_operands = 0 : i64, tpu.core_type = #tpu.core_type<tc>, window_params = [{transform_indices = @transform_0, window_bounds = array<i64: 1, 4, 256>}, {transform_indices = @transform_1, window_bounds = array<i64: 1, 1, 256>}, {pipeline_mode = #tpu.pipeline_mode<synchronous>, transform_indices = @transform_2, window_bounds = array<i64: 4, 1>}, {transform_indices = @transform_3, window_bounds = array<i64: 1, 1, 256>}, {transform_indices = @transform_4, window_bounds = array<i64: 1, 1, 256>}]} {
    %c0_i32 = arith.constant 0 : i32
    %0 = arith.cmpi eq, %arg1, %c0_i32 : i32
    %1 = arith.extui %0 : i1 to i32
    %c0_i32_0 = arith.constant 0 : i32
    %2 = arith.cmpi ne, %1, %c0_i32_0 : i32
    scf.if %2 {
      %cst_32 = arith.constant 0.000000e+00 : f32
      %67 = vector.broadcast %cst_32 : f32 to vector<1x1x256xf32>
      %c0_33 = arith.constant 0 : index
      %c0_34 = arith.constant 0 : index
      %c0_35 = arith.constant 0 : index
      %68 = vector.load %arg5[%c0_33, %c0_34, %c0_35] : memref<1x1x256xf32, #tpu.memory_space<vmem>>, vector<1x1x256xf32>
      tpu.vector_store %arg5[%c0_33, %c0_34, %c0_35], %67 {strides = array<i32>} : memref<1x1x256xf32, #tpu.memory_space<vmem>>, vector<1x1x256xf32>,
      %cst_36 = arith.constant 0.000000e+00 : f32
      %69 = vector.broadcast %cst_36 : f32 to vector<1x1x256xf32>
      %c0_37 = arith.constant 0 : index
      %c0_38 = arith.constant 0 : index
      %c0_39 = arith.constant 0 : index
      %70 = vector.load %arg6[%c0_37, %c0_38, %c0_39] : memref<1x1x256xf32, #tpu.memory_space<vmem>>, vector<1x1x256xf32>
      tpu.vector_store %arg6[%c0_37, %c0_38, %c0_39], %69 {strides = array<i32>} : memref<1x1x256xf32, #tpu.memory_space<vmem>>, vector<1x1x256xf32>,
    } else {
    }
    %c0 = arith.constant 0 : index
    %c0_1 = arith.constant 0 : index
    %c0_2 = arith.constant 0 : index
    %3 = vector.load %arg2[%c0, %c0_1, %c0_2] : memref<1x4x256xf32, #tpu.memory_space<vmem>>, vector<1x4x256xf32>
    %4 = vector.shape_cast %3 : vector<1x4x256xf32> to vector<4x256xf32>
    %c0_3 = arith.constant 0 : index
    %c0_4 = arith.constant 0 : index
    %c0_5 = arith.constant 0 : index
    %5 = vector.load %arg3[%c0_3, %c0_4, %c0_5] : memref<1x1x256xi32, #tpu.memory_space<vmem>>, vector<1x1x256xi32>
    %6 = vector.shape_cast %5 : vector<1x1x256xi32> to vector<1x256xi32>
    %c0_6 = arith.constant 0 : index
    %c0_7 = arith.constant 0 : index
    %7 = vector.load %arg4[%c0_6, %c0_7] : memref<4x1xf32, #tpu.memory_space<vmem>>, vector<4x1xf32>
    %8 = tpu.iota {dimensions = array<i32: 1>} : vector<1x256xi32>
    %c256_i32 = arith.constant 256 : i32
    %9 = arith.muli %arg1, %c256_i32 : i32
    %10 = vector.broadcast %9 : i32 to vector<1x256xi32>
    %11 = arith.addi %10, %8 : vector<1x256xi32>
    %c256_i32_8 = arith.constant 256 : i32
    %12 = vector.broadcast %c256_i32_8 : i32 to vector<1x256xi32>
    %13 = arith.cmpi slt, %11, %12 : vector<1x256xi32>
    %c-100_i32 = arith.constant -100 : i32
    %14 = vector.broadcast %c-100_i32 : i32 to vector<1x256xi32>
    %15 = arith.select %13, %6, %14 : vector<1x256xi1>, vector<1x256xi32>
    %c-100_i32_9 = arith.constant -100 : i32
    %16 = vector.broadcast %c-100_i32_9 : i32 to vector<1x256xi32>
    %17 = arith.cmpi ne, %15, %16 : vector<1x256xi32>
    %cst = arith.constant 0.000000e+00 : f32
    %18 = vector.shape_cast %13 : vector<1x256xi1> to vector<1x256xi1>
    %19 = vector.broadcast %18 : vector<1x256xi1> to vector<4x256xi1>
    %20 = vector.broadcast %cst : f32 to vector<4x256xf32>
    %21 = arith.select %19, %4, %20 : vector<4x256xi1>, vector<4x256xf32>
    %cst_10 = arith.constant dense<0xFF800000> : vector<256xf32>
    %22 = vector.multi_reduction <maximumf>, %21, %cst_10 [0] : vector<4x256xf32> to vector<256xf32>
    %23 = vector.shape_cast %22 : vector<256xf32> to vector<1x256xf32>
    %24 = vector.broadcast %23 : vector<1x256xf32> to vector<4x256xf32>
    %25 = arith.subf %21, %24 : vector<4x256xf32>
    %26 = math.exp %25 : vector<4x256xf32>
    %cst_11 = arith.constant dense<0.000000e+00> : vector<256xf32>
    %27 = vector.multi_reduction <add>, %26, %cst_11 [0] : vector<4x256xf32> to vector<256xf32>
    %28 = vector.shape_cast %27 : vector<256xf32> to vector<1x256xf32>
    %29 = math.log %28 : vector<1x256xf32>
    %30 = vector.broadcast %29 : vector<1x256xf32> to vector<4x256xf32>
    %31 = arith.subf %25, %30 : vector<4x256xf32>
    %32 = tpu.iota {dimensions = array<i32: 0>} : vector<4x256xi32>
    %33 = vector.broadcast %15 : vector<1x256xi32> to vector<4x256xi32>
    %34 = arith.cmpi eq, %32, %33 : vector<4x256xi32>
    %cst_12 = arith.constant 0.000000e+00 : f32
    %35 = vector.broadcast %cst_12 : f32 to vector<4x256xf32>
    %36 = arith.select %34, %31, %35 : vector<4x256xi1>, vector<4x256xf32>
    %cst_13 = arith.constant dense<0.000000e+00> : vector<256xf32>
    %37 = vector.multi_reduction <add>, %36, %cst_13 [0] : vector<4x256xf32> to vector<256xf32>
    %38 = vector.shape_cast %37 : vector<256xf32> to vector<1x256xf32>
    %cst_14 = arith.constant 0.000000e+00 : f32
    %39 = vector.shape_cast %7 : vector<4x1xf32> to vector<4x1xf32>
    %40 = vector.broadcast %39 : vector<4x1xf32> to vector<4x256xf32>
    %41 = vector.broadcast %cst_14 : f32 to vector<4x256xf32>
    %42 = arith.select %34, %40, %41 : vector<4x256xi1>, vector<4x256xf32>
    %cst_15 = arith.constant dense<0.000000e+00> : vector<256xf32>
    %43 = vector.multi_reduction <add>, %42, %cst_15 [0] : vector<4x256xf32> to vector<256xf32>
    %44 = vector.shape_cast %43 : vector<256xf32> to vector<1x256xf32>
    %cst_16 = arith.constant 0.000000e+00 : f32
    %45 = vector.broadcast %cst_16 : f32 to vector<1x256xf32>
    %46 = arith.subf %45, %44 : vector<1x256xf32>
    %47 = arith.mulf %46, %38 : vector<1x256xf32>
    %48 = math.exp %38 : vector<1x256xf32>
    %cst_17 = arith.constant 1.000000e+00 : f32
    %49 = vector.broadcast %cst_17 : f32 to vector<1x256xf32>
    %50 = arith.subf %49, %48 : vector<1x256xf32>
    %cst_18 = arith.constant 0.000000e+00 : f32
    %51 = vector.broadcast %cst_18 : f32 to vector<1x256xf32>
    %52 = arith.maximumf %50, %51 : vector<1x256xf32>
    %53 = arith.mulf %52, %52 : vector<1x256xf32>
    %54 = arith.mulf %53, %47 : vector<1x256xf32>
    %cst_19 = arith.constant 0.000000e+00 : f32
    %55 = vector.broadcast %cst_19 : f32 to vector<1x256xf32>
    %56 = arith.select %17, %54, %55 : vector<1x256xi1>, vector<1x256xf32>
    %c0_20 = arith.constant 0 : index
    %c0_21 = arith.constant 0 : index
    %c0_22 = arith.constant 0 : index
    %57 = vector.load %arg5[%c0_20, %c0_21, %c0_22] : memref<1x1x256xf32, #tpu.memory_space<vmem>>, vector<1x1x256xf32>
    %58 = vector.shape_cast %56 : vector<1x256xf32> to vector<1x1x256xf32>
    %59 = arith.addf %57, %58 : vector<1x1x256xf32>
    %c0_23 = arith.constant 0 : index
    %c0_24 = arith.constant 0 : index
    %c0_25 = arith.constant 0 : index
    %60 = vector.load %arg5[%c0_23, %c0_24, %c0_25] : memref<1x1x256xf32, #tpu.memory_space<vmem>>, vector<1x1x256xf32>
    tpu.vector_store %arg5[%c0_23, %c0_24, %c0_25], %59 {strides = array<i32>} : memref<1x1x256xf32, #tpu.memory_space<vmem>>, vector<1x1x256xf32>,
    %c0_26 = arith.constant 0 : index
    %c0_27 = arith.constant 0 : index
    %c0_28 = arith.constant 0 : index
    %61 = vector.load %arg6[%c0_26, %c0_27, %c0_28] : memref<1x1x256xf32, #tpu.memory_space<vmem>>, vector<1x1x256xf32>
    %62 = arith.extui %17 : vector<1x256xi1> to vector<1x256xi32>
    %63 = arith.sitofp %62 : vector<1x256xi32> to vector<1x256xf32>
    %64 = vector.shape_cast %63 : vector<1x256xf32> to vector<1x1x256xf32>
    %65 = arith.addf %61, %64 : vector<1x1x256xf32>
    %c0_29 = arith.constant 0 : index
    %c0_30 = arith.constant 0 : index
    %c0_31 = arith.constant 0 : index
    %66 = vector.load %arg6[%c0_29, %c0_30, %c0_31] : memref<1x1x256xf32, #tpu.memory_space<vmem>>, vector<1x1x256xf32>
    tpu.vector_store %arg6[%c0_29, %c0_30, %c0_31], %65 {strides = array<i32>} : memref<1x1x256xf32, #tpu.memory_space<vmem>>, vector<1x1x256xf32>,
    return
  }
  func.func @transform_0(%arg0: i32, %arg1: i32) -> (i32, i32, i32) {
    %c0_i32 = arith.constant 0 : i32
    %c0_i32_0 = arith.constant 0 : i32
    return %arg0, %c0_i32, %arg1 : i32, i32, i32
  }
  func.func @transform_1(%arg0: i32, %arg1: i32) -> (i32, i32, i32) {
    %c0_i32 = arith.constant 0 : i32
    %c0_i32_0 = arith.constant 0 : i32
    return %arg0, %c0_i32, %arg1 : i32, i32, i32
  }
  func.func @transform_2(%arg0: i32, %arg1: i32) -> (i32, i32) {
    %c0_i32 = arith.constant 0 : i32
    %c0_i32_0 = arith.constant 0 : i32
    %c0_i32_1 = arith.constant 0 : i32
    return %c0_i32, %c0_i32_0 : i32, i32
  }
  func.func @transform_3(%arg0: i32, %arg1: i32) -> (i32, i32, i32) {
    %c0_i32 = arith.constant 0 : i32
    %c0_i32_0 = arith.constant 0 : i32
    %c0_i32_1 = arith.constant 0 : i32
    return %arg0, %c0_i32, %c0_i32_0 : i32, i32, i32
  }
  func.func @transform_4(%arg0: i32, %arg1: i32) -> (i32, i32, i32) {
    %c0_i32 = arith.constant 0 : i32
    %c0_i32_0 = arith.constant 0 : i32
    %c0_i32_1 = arith.constant 0 : i32
    return %arg0, %c0_i32, %c0_i32_0 : i32, i32, i32
  }
}

</mosaic_0001>

<bundles_post_ra>
// kernel: tpu_custom_call.1
= control target key start
LH: loop header
LB: loop body
LE: loop exit
PB: predicated region body
PF: predicated region fallthrough
CT: control target
= control target key end

     0   :  { %10 = vsyncpa [#allocation3], 0  ;;  %s1153_s0 = inlined_call_operand.hbm [shape: f32[2,4,256], index: 0, kind: input, shape index: {}]   ;;  %s1154_s1 = inlined_call_operand.vmem [shape: s32[2,1,256], index: 1, kind: input, shape index: {}]   ;;  %s1155_s2 = inlined_call_operand.vmem [shape: f32[4,1], index: 2, kind: input, shape index: {}]   ;;  %s1156_s3 = inlined_call_operand.hbm [shape: f32[2,1,256], index: 3, kind: output, shape index: {0}]   ;;  %s1157_s4 = inlined_call_operand.hbm [shape: f32[2,1,256], index: 4, kind: output, shape index: {1}]  }
   0x1   :  { %12 = vsyncpa [#allocation3 + $0x1], 0 }
   0x2   :  { %13 = vsyncpa [#allocation4], 0 }
   0x3   :  { %15 = vsyncpa [#allocation4 + $0x1], 0 }
   0x4   :  { %16 = vsyncpa [#allocation7], 0 }
   0x5   :  { %18 = vsyncpa [#allocation7 + $0x1], 0  ;;  %s918_s15 = smov 0   ;;  %s920_s16 = smov 0  }
   0x6   :  { %s922_s17 = smov 0   ;;  %s924_s18 = smov 0  }
   0x7   :  { %s926_s19 = smov 0   ;;  %s928_s20 = smov 0  }
   0x8 LB: > { %s638_s21 = sadd.s32 4294967295, %s885_s20   ;;  %s639_s22 = sadd.s32 4294967294, %s885_s20   ;;  %s885_s20 = sphi %s928_s20, %s24_s20   ;;  %s881_s19 = sphi %s926_s19, %s1175_s19   ;;  %s877_s18 = sphi %s924_s18, %s1174_s18   ;;  %s873_s17 = sphi %s922_s17, %s1173_s17   ;;  %s869_s16 = sphi %s920_s16, %s1172_s16   ;;  %s865_s15 = sphi %s918_s15, %s1171_s15  }
   0x9   : > { %s36_s23 = sadd.s32 1, %s881_s19  ;;  %s45_s24 = sadd.s32 1, %s873_s17 }
   0xa   : > { %p38_p0 = scmp.ge.s32.totalorder %s36_s23, 2  ;;  %p52_p1 = scmp.ne.s32.totalorder %s873_s17, %s869_s16 }
   0xb   : > { %p53_p2 = scmp.eq.s32.totalorder %s885_s20, 0  ;;  %p58_p3 = scmp.ne.s32.totalorder %s869_s16, %s865_s15 }
   0xc   : > { %s1177_s23 = smov (%p38_p0, %s36_s23), 0  ;;  %p59_p5 = scmp.eq.s32.totalorder %s638_s21, 0 }
   0xd   : > { %p959_p4 = por %p53_p2, %p52_p1  ;;  %s40_s26 = ssub.s32 %s881_s19, %s1177_s23 }
   0xe   : > { %p131_p6 = scmp.eq.s32.totalorder %s638_s21, 1  ;;  %p43_p7 = scmp.eq.s32.totalorder %s40_s26, 0 }
   0xf   : > { %p965_p8 = por %p59_p5, %p58_p3  ;;  %p137_p10 = scmp.eq.s32.totalorder %s639_s22, 1 }
  0x10   : > { %p969_p9 = por %p131_p6, %p52_p1  ;;  %p680_p13 = scmp.lt.s32.totalorder %s885_s20, 2 }
  0x11   : > { %s974_s29 = scalar_select %p43_p7, %s873_s17, %s45_s24  }
  0x12   : > { %p976_p11 = por %p137_p10, %p58_p3  ;;  %s186_s5 = sand.u32 1, %s873_s17  }
  0x13   : > { %s642_s6 = sshll.u32 %s186_s5, 3  ;;  %s660_s7 = sshll.u32 %s881_s19, 7 }
  0x14   : > { %s1161_s30 = scalar_select %p976_p11, 1, 0 }
  0x15   : > { %s198_s10 = scalar_lea.hbm %s1153_s0, %s660_s7  ;;  %s190_s11 = scalar_lea.vmem [#allocation2], %s642_s6 }
  0x16   : > { %s200_s12 = sshll.u32 %s190_s11, 4  ;;  %p989_p0 = pnand %p680_p13, %p959_p4  ;;  %s201_s12 = int_to_ptr.vmem [resolvable:$true] %s200_s12 }
  0x17   : > { %p645_p1 = scmp.ge.s32.totalorder %s885_s20, 1  ;;  %p217_p2 = scmp.lt.s32.totalorder %s885_s20, 3 }
  0x18   : > { %s187_s14 = scalar_lea.sflag [#allocation3], %s186_s5  ;;  %p749_p3 = pneg %p989_p0 }
  0x19   : > { %s760_s21 = scalar_lea.vmem %s201_s12, 128  ;;  %s887_s22 = smov [#allocation2]  }
  0x1a   : > { %p761_p5 = scmp.ne.s32.totalorder %s201_s12, %s760_s21  ;;  %s765_s24 = sshll.u32 %s887_s22, 4  ;;  %s766_s24 = int_to_ptr.vmem [resolvable:$false] %s765_s24 }
  0x1b   : > { %s767_s26 = scalar_lea.vmem %s766_s24, 256  ;;  %p768_p10 = scmp.lt.s32.totalorder %s201_s12, %s766_s24 }
  0x1c   : > { %p763_p6 = pnand %p761_p5, %p749_p3  ;;  %p769_p12 = scmp.lt.s32.totalorder %s767_s26, %s760_s21 }
  0x1e   : > { %p764_p7 = pneg %p763_p6  ;;  %p770_p4 = por %p769_p12, %p768_p10 }
  0x20   : > { %p771_p13 = pnand %p770_p4, %p764_p7 }
  0x22   : > { %774 = shalt.err (!%p771_p13)
}
  0x23   : > { %672 = dma.hbm_to_vmem [thread:$0]  (!%p989_p0), %s198_s10, 128, %s201_s12, %s187_s14  }
  0x24   : > { %p218_p11 = pnand %p645_p1, %p217_p2 }
  0x25   : > { %s1004_s25 = sand.u32 (!%p218_p11), 1, %s869_s16  }
  0x26   : > { %221 = sbr.rel (%p218_p11) target bundleno = 212 (0xd4), region = 32  ;;  %s646_s5 = sshll.u32 (!%p218_p11), %s1004_s25, 3 }
  0x27   : > { %s224_s6 = scalar_lea.sflag (!%p218_p11), [#allocation3], %s1004_s25  ;;  %s227_s7 = scalar_lea.vmem (!%p218_p11), [#allocation2], %s646_s5 }
  0x2b   : > { %852 = dma.done.wait (%p965_p8), %s224_s6, 128  }
  0x2c   : > { %854 = vsyncadd (%p965_p8), %s224_s6, 4294967168  ;;  %p267_p12 = scmp.lt.s32.totalorder %s877_s18, 1  ;;  %v279_v0 = vlaneseq  ;;  %v888_v1 = vmov 0   ;;  %vm318_vm0 = vcmask 1043456   ;;  %v287_v5 = vld [vmem:[%s1155_s2] sm:$0xf] }
  0x2d   : > { %733 = vset.pattern.permute.xlu0 %v888_v1  ;;  %v285_v6 = vld [vmem:[%s227_s7] sm:$0xff]  ;;  %v889_v22 = vmov 1966171168   ;;  %s647_s27 = sshll.u32 %s1004_s25, 1  ;;  %v890_v37 = vmov 0.0   ;;  %s661_s24 = sshll.u32 %s877_s18, 5 }
  0x2e   : > { %s268_s8 = scalar_select %p267_p12, %s877_s18, 1  ;;  %v298_v2 = vshrl.u32 %v279_v0, 7  ;;  %389 = vperm.xlu0 %733, %v287_v5   ;;  %v314_v10 = vcombine.high %v285_v6, %v285_v6  ;;  %v319_v11 = vsel %vm318_vm0, %v285_v6, -inf  ;;  %v431_v23 = vunpack.c.l.s4 %v889_v22 }
  0x2f   : > { %v320_v12 = vrot.slane %v319_v11, 4  ;;  %vm1041_vm5 = vcmp.lt.s32.totalorder %v279_v0, 256  ;;  %s1050_s21 = scalar_lea.vmem [#allocation5], %s647_s27  ;;  %s264_s22 = scalar_lea.vmem [#allocation6], %s647_s27 }
  0x30   : > { %s649_s9 = sshll.u32 %s268_s8, 1  ;;  %v299_v3 = vsub.s32 0, %v298_v2  ;;  %v303_v4 = vsub.s32 1, %v298_v2  ;;  %v326_v13 = vsel %vm318_vm0, %v314_v10, -inf  ;;  %v432_v28 = vunpack.c.0.s8 %v431_v23  ;;  %283 = vst.msk [vmem:[%s1050_s21] sm:$0x3] %vm1041_vm5, %v890_v37  ;;  %s508_s6 = scalar_lea.hbm %s1157_s4, %s661_s24 }
  0x31   : > { %s273_s12 = scalar_lea.vmem %s1154_s1, %s649_s9  ;;  %v321_v15 = vmax.f32 %v319_v11, %v320_v12  ;;  %v327_v16 = vrot.slane %v326_v13, 4  ;;  %284 = vst.msk [vmem:[%s264_s22] sm:$0x3] %vm1041_vm5, %v890_v37  ;;  %s510_s7 = sshll.u32 %s264_s22, 4  ;;  %s511_s7 = int_to_ptr.vmem [resolvable:$true] %s510_s7 }
  0x32   : > { %v286_v7 = vld [vmem:[%s273_s12] sm:$0x3]  ;;  %v1045_v34 = vsub.s32 %v432_v28, %v298_v2  ;;  %s482_s8 = scalar_lea.sflag [#allocation7], %s1004_s25  ;;  %s775_s9 = scalar_lea.vmem %s511_s7, 32 }
  0x33   : > { %v1020_v8 = vrot.slane %v286_v7, %v299_v3  ;;  %v1022_v9 = vrot.slane %v286_v7, %v303_v4  ;;  %v322_v19 = vrot.slane %v321_v15, 2  ;;  %v328_v20 = vmax.f32 %v326_v13, %v327_v16  ;;  %p776_p8 = scmp.ne.s32.totalorder %s511_s7, %s775_s9  ;;  %s891_s10 = smov [#allocation6]  }
  0x34   : > { %s779_s11 = sshll.u32 %s891_s10, 4  ;;  %s780_s11 = int_to_ptr.vmem [resolvable:$false] %s779_s11 }
  0x35   : > { %v364_v14 = vrot.slane %v1020_v8, %v299_v3  ;;  %v368_v17 = vrot.slane %v1022_v9, %v299_v3  ;;  %v323_v24 = vmax.f32 %v321_v15, %v322_v19  ;;  %v329_v25 = vrot.slane %v328_v20, 2  ;;  %p777_p11 = pnand %p776_p8, %p969_p9  ;;  %s781_s12 = scalar_lea.vmem %s780_s11, 64 }
  0x36   : > { %vm307_vm3 = vcmp.ne.s32.totalorder %v1020_v8, 4294967196  ;;  %vm308_vm4 = vcmp.ne.s32.totalorder %v1022_v9, 4294967196  ;;  %p782_p1 = scmp.lt.s32.totalorder %s511_s7, %s780_s11  ;;  %p783_p2 = scmp.lt.s32.totalorder %s781_s12, %s775_s9 }
  0x37   : > { %vm1028_vm1 = vcmp.eq.s32.totalorder %v298_v2, %v364_v14  ;;  %vm1032_vm2 = vcmp.eq.s32.totalorder %v298_v2, %v368_v17  ;;  %v324_v26 = vrot.slane %v323_v24, 1  ;;  %v330_v27 = vmax.f32 %v328_v20, %v329_v25  ;;  %p778_p0 = pneg %p777_p11 }
  0x38   : > { %v650_v38 = vsel %vm307_vm3, 1.0, %v890_v37  ;;  %v651_v39 = vsel %vm308_vm4, 1.0, %v890_v37  ;;  %v451_v44 = vld [vmem:[%s264_s22] sm:$0x3]  ;;  %p784_p3 = por %p783_p2, %p782_p1 }
  0x39   : > { %v325_v29 = vmax.f32 %v323_v24, %v324_v26  ;;  %v331_v30 = vrot.slane %v330_v27, 1  ;;  %v458_v41 = vcombine.low %v650_v38, %v651_v39 }
  0x3a   : > { %p785_p5 = pnand %p784_p3, %p778_p0 }
  0x3b   : > { %v332_v31 = vmax.f32 %v330_v27, %v331_v30  ;;  %v1038_v32 = vsub.f32 %v285_v6, %v325_v29  ;;  %v465_v42 = vrot.slane %v458_v41, %v1045_v34 }
  0x3d   : > { %v1047_v35 = vsub.f32 %v314_v10, %v332_v31  ;;  %v335_v36 = vmul.f32 1.442695, %v1038_v32  ;;  %v472_v43 = vrot.slane %v465_v42, %v1045_v34 }
  0x3f   : > { %735 = vpow2.f32 %v335_v36  ;;  %v337_v40 = vmul.f32 1.442695, %v1047_v35  ;;  %v474_v45 = vadd.f32 %v472_v43, %v451_v44 }
  0x41   : > { %737 = vpow2.f32 %v337_v40  ;;  %475 = vst.msk [vmem:[%s264_s22] sm:$0x3] %vm1041_vm5, %v474_v45 }
  0x42   : > { %788 = shalt.err (!%p785_p5)
}
  0x43   : > { %s789_s13 = scalar_lea.hbm %s508_s6, 32  ;;  %s793_s22 = scalar_lea.hbm %s1157_s4, 64 }
  0x44   : > { %p790_p6 = scmp.ne.s32.totalorder %s508_s6, %s789_s13  ;;  %p794_p4 = scmp.lt.s32.totalorder %s508_s6, %s1157_s4 }
  0x45   : > { %p795_p13 = scmp.lt.s32.totalorder %s793_s22, %s789_s13 }
  0x46   : > { %p791_p7 = pnand %p790_p6, %p969_p9 }
  0x47   : > { %p796_p12 = por %p795_p13, %p794_p4 }
  0x48   : > { %p792_p10 = pneg %p791_p7 }
  0x4a   : > { %p797_p8 = pnand %p796_p12, %p792_p10 }
  0x4c   : > { %800 = shalt.err (!%p797_p8)
}
  0x4d   : > { %666 = dma.vmem_to_hbm [thread:$0]  (%p969_p9), %s511_s7, 32, %s508_s6, %s482_s8   ;;  %v736_v46 = vpop.eup %735 }
  0x4e   : > { %v339_v47 = vsel %vm318_vm0, %v736_v46, 0.0  ;;  %v738_v48 = vpop.eup %737  ;;  %s496_s6 = sshll.u32 %s1050_s21, 4  ;;  %s494_s9 = scalar_lea.hbm %s1156_s3, %s661_s24  ;;  %s497_s6 = int_to_ptr.vmem [resolvable:$true] %s496_s6 }
  0x4f   : > { %v340_v49 = vrot.slane %v339_v47, 4  ;;  %v346_v50 = vsel %vm318_vm0, %v738_v48, 0.0  ;;  %s477_s10 = scalar_lea.sflag [#allocation4], %s1004_s25  ;;  %s801_s11 = scalar_lea.vmem %s497_s6, 32 }
  0x50   : > { %v347_v51 = vrot.slane %v346_v50, 4  ;;  %p802_p11 = scmp.ne.s32.totalorder %s497_s6, %s801_s11  ;;  %s892_s12 = smov [#allocation5]  }
  0x51   : > { %v341_v52 = vadd.f32 %v340_v49, %v339_v47  ;;  %s805_s13 = sshll.u32 %s892_s12, 4  ;;  %s806_s13 = int_to_ptr.vmem [resolvable:$false] %s805_s13 }
  0x52   : > { %v348_v53 = vadd.f32 %v347_v51, %v346_v50  ;;  %p803_p0 = pnand %p802_p11, %p969_p9  ;;  %s807_s14 = scalar_lea.vmem %s806_s13, 64 }
  0x53   : > { %v342_v54 = vrot.slane %v341_v52, 2  ;;  %p808_p2 = scmp.lt.s32.totalorder %s497_s6, %s806_s13  ;;  %p809_p3 = scmp.lt.s32.totalorder %s807_s14, %s801_s11 }
  0x54   : > { %v349_v55 = vrot.slane %v348_v53, 2  ;;  %p804_p1 = pneg %p803_p0 }
  0x55   : > { %v343_v56 = vadd.f32 %v342_v54, %v341_v52  ;;  %p810_p5 = por %p809_p3, %p808_p2 }
  0x56   : > { %v350_v57 = vadd.f32 %v349_v55, %v348_v53 }
  0x57   : > { %v344_v58 = vrot.slane %v343_v56, 1  ;;  %p811_p6 = pnand %p810_p5, %p804_p1 }
  0x58   : > { %v351_v59 = vrot.slane %v350_v57, 1 }
  0x59   : > { %v345_v60 = vadd.f32 %v344_v58, %v343_v56 }
  0x5a   : > { %v352_v61 = vadd.f32 %v351_v59, %v350_v57 }
  0x5b   : > { %739 = vlog2.f32 %v345_v60 }
  0x5c   : > { %741 = vlog2.f32 %v352_v61  ;;  %v426_v61 = vld [vmem:[%s1050_s21] sm:$0x3] }
  0x68   : > { %v740_v62 = vpop.eup %739 }
  0x69   : > { %v742_v63 = vpop.eup %741  ;;  %v354_v0 = vmul.f32 0.6931472, %v740_v62 }
  0x6a   : > { %v356_v1 = vmul.f32 0.6931472, %v742_v63 }
  0x6b   : > { %v357_v2 = vsub.f32 %v1038_v32, %v354_v0 }
  0x6c   : > { %v358_v3 = vsub.f32 %v1047_v35, %v356_v1 }
  0x6d   : > { %v371_v4 = vsel %vm1028_vm1, %v357_v2, 0.0 }
  0x6e   : > { %v372_v5 = vsel %vm1032_vm2, %v358_v3, 0.0  ;;  %v373_v6 = vsel %vm318_vm0, %v371_v4, 0.0 }
  0x6f   : > { %v380_v7 = vsel %vm318_vm0, %v372_v5, 0.0  ;;  %v374_v10 = vrot.slane %v373_v6, 4 }
  0x70   : > { %v381_v11 = vrot.slane %v380_v7, 4 }
  0x71   : > { %v375_v12 = vadd.f32 %v374_v10, %v373_v6 }
  0x72   : > { %v382_v13 = vadd.f32 %v381_v11, %v380_v7 }
  0x73   : > { %v376_v14 = vrot.slane %v375_v12, 2 }
  0x74   : > { %v383_v15 = vrot.slane %v382_v13, 2 }
  0x75   : > { %v377_v16 = vadd.f32 %v376_v14, %v375_v12 }
  0x76   : > { %v384_v17 = vadd.f32 %v383_v15, %v382_v13 }
  0x77   : > { %v378_v19 = vrot.slane %v377_v16, 1 }
  0x78   : > { %v385_v20 = vrot.slane %v384_v17, 1 }
  0x79   : > { %v379_v22 = vadd.f32 %v378_v19, %v377_v16 }
  0x7a   : > { %v386_v23 = vadd.f32 %v385_v20, %v384_v17 }
  0x7b   : > { %v412_v24 = vmul.f32 1.442695, %v379_v22 }
  0x7c   : > { %v414_v25 = vmul.f32 1.442695, %v386_v23 }
  0x7d   : > { %743 = vpow2.f32 %v412_v24 }
  0x7e   : > { %745 = vpow2.f32 %v414_v25 }
  0x8a   : > { %v744_v31 = vpop.eup %743 }
  0x8b   : > { %v746_v36 = vpop.eup %745  ;;  %v416_v41 = vsub.f32 1.0, %v744_v31 }
  0x8c   : > { %v417_v42 = vsub.f32 1.0, %v746_v36 }
  0x8d   : > { %v418_v21 = vmax.f32 %v416_v41, 0.0 }
  0x8e   : > { %v419_v46 = vmax.f32 %v417_v42, 0.0 }
  0x8f   : > { %v420_v51 = vmul.f32 %v418_v21, %v418_v21 }
  0x90   : > { %v421_v52 = vmul.f32 %v419_v46, %v419_v46 }
  0xa9   : > { %v390_v26 = vpop.permute.xlu0 %389 }
  0xaa   : > { %v392_v27 = vsel %vm1028_vm1, %v390_v26, 0.0  ;;  %v393_v28 = vsel %vm1032_vm2, %v390_v26, 0.0 }
  0xab   : > { %v394_v29 = vsel %vm318_vm0, %v392_v27, 0.0  ;;  %v401_v30 = vsel %vm318_vm0, %v393_v28, 0.0 }
  0xac   : > { %v395_v32 = vrot.slane %v394_v29, 4  ;;  %v402_v35 = vrot.slane %v401_v30, 4 }
  0xae   : > { %v396_v37 = vadd.f32 %v395_v32, %v394_v29  ;;  %v403_v38 = vadd.f32 %v402_v35, %v401_v30 }
  0xb0   : > { %v397_v39 = vrot.slane %v396_v37, 2  ;;  %v404_v40 = vrot.slane %v403_v38, 2 }
  0xb2   : > { %v398_v43 = vadd.f32 %v397_v39, %v396_v37  ;;  %v405_v18 = vadd.f32 %v404_v40, %v403_v38 }
  0xb4   : > { %v399_v44 = vrot.slane %v398_v43, 1  ;;  %v406_v45 = vrot.slane %v405_v18, 1 }
  0xb6   : > { %v400_v47 = vadd.f32 %v399_v44, %v398_v43  ;;  %v407_v48 = vadd.f32 %v406_v45, %v405_v18 }
  0xb8   : > { %v408_v49 = vsub.f32 0.0, %v400_v47  ;;  %v409_v50 = vsub.f32 0.0, %v407_v48 }
  0xba   : > { %v410_v53 = vmul.f32 %v408_v49, %v379_v22  ;;  %v411_v54 = vmul.f32 %v409_v50, %v386_v23 }
  0xbc   : > { %v422_v55 = vmul.f32 %v420_v51, %v410_v53  ;;  %v423_v56 = vmul.f32 %v421_v52, %v411_v54 }
  0xbe   : > { %v424_v57 = vsel %vm307_vm3, %v422_v55, 0.0  ;;  %v425_v58 = vsel %vm308_vm4, %v423_v56, 0.0 }
  0xbf   : > { %v429_v59 = vcombine.low %v424_v57, %v425_v58 }
  0xc1   : > { %v436_v60 = vrot.slane %v429_v59, %v1045_v34 }
  0xc3   : > { %v443_v62 = vrot.slane %v436_v60, %v1045_v34 }
  0xc5   : > { %v445_v63 = vadd.f32 %v443_v62, %v426_v61 }
  0xc7   : > { %450 = vst.msk [vmem:[%s1050_s21] sm:$0x3] %vm1041_vm5, %v445_v63 }
  0xc8   : > { %814 = shalt.err (!%p811_p6)
}
  0xc9   : > { %s815_s18 = scalar_lea.hbm %s494_s9, 32  ;;  %s819_s24 = scalar_lea.hbm %s1156_s3, 64 }
  0xca   : > { %p816_p7 = scmp.ne.s32.totalorder %s494_s9, %s815_s18  ;;  %p820_p13 = scmp.lt.s32.totalorder %s494_s9, %s1156_s3 }
  0xcb   : > { %p821_p12 = scmp.lt.s32.totalorder %s819_s24, %s815_s18 }
  0xcc   : > { %p817_p10 = pnand %p816_p7, %p969_p9 }
  0xcd   : > { %p822_p8 = por %p821_p12, %p820_p13 }
  0xce   : > { %p818_p4 = pneg %p817_p10 }
  0xd0   : > { %p823_p11 = pnand %p822_p8, %p818_p4 }
  0xd2   : > { %826 = shalt.err (!%p823_p11)
}
  0xd3   : > { %665 = dma.vmem_to_hbm [thread:$0]  (%p969_p9), %s497_s6, 32, %s494_s9, %s477_s10  }
  0xd4 PF: > { %s522_s26 = sand.u32 1, %s865_s15   ;;  %p1169_p0 = scmp.ne.s32.totalorder %s1161_s30, 0 }
  0xd5   : > { %p1170_p1 = scmp.ge.s32.totalorder %s885_s20, 2  ;;  %s523_s5 = scalar_lea.sflag [#allocation4], %s522_s26 }
  0xd7   : > { %p674_p2 = pnand %p1170_p1, %p1169_p0 }
  0xd9   : > { %p675_p3 = pneg %p674_p2 }
  0xdb   : > { %856 = dma.done.wait (%p675_p3), %s523_s5, 32  }
  0xdc   : > { %858 = vsyncadd (%p675_p3), %s523_s5, 4294967264  ;;  %s532_s7 = scalar_lea.sflag [#allocation7], %s522_s26 }
  0xdd   : > { %860 = dma.done.wait (%p675_p3), %s532_s7, 32  }
  0xde   : > { %862 = vsyncadd (%p675_p3), %s532_s7, 4294967264  ;;  %s24_s20 = sadd.s32 1, %s885_s20   ;;  %s1171_s15 = smov %s869_s16 }
  0xdf   : > { %p21_p5 = scmp.ge.s32.totalorder %s24_s20, 4   ;;  %s1172_s16 = smov %s873_s17 }
  0xe0   : > { %s1173_s17 = smov %s974_s29  ;;  %s1174_s18 = smov %s881_s19 }
  0xe1   : > { %s1175_s19 = smov %s1177_s23  ;;  %23 = sbr.rel (!%p21_p5) target bundleno = 8 (0x8), region = 101 }
  0xe6   :  { %537 = vsyncpa [#allocation3], 1 }
  0xe7   :  { %539 = vsyncpa [#allocation3 + $0x1], 1 }
  0xe8   :  { %540 = vsyncpa [#allocation4], 1 }
  0xe9   :  { %542 = vsyncpa [#allocation4 + $0x1], 1 }
  0xea   :  { %543 = vsyncpa [#allocation7], 1 }
  0xeb   :  { %545 = vsyncpa [#allocation7 + $0x1], 1 }

</bundles_post_ra>
